<compile_context>
chip_gen: v6e
topology: v6e:2x2x1
jax: 0.10.0
libtpu: 0.0.40
codegen_flags: <defaults>
</compile_context>

<pallas_src>
import functools

import jax
import jax.numpy as jnp
from jax.experimental import pallas as pl
from jax.experimental.pallas import tpu as pltpu


def _cdiv(a, b):
    return -(-a // b)


def _round_up(x, m):
    return _cdiv(x, m) * m


# Only bother single-buffering the resident weight when it saves >= 2 MiB.
_SINGLE_BUFFER_MIN_BYTES = 2 << 20


def _vmem_capacity_bytes(default=64 << 20):
    """Physical VMEM per TensorCore (v5e/v6e: 128 MiB, v7x: 64 MiB)."""
    try:
        cap = getattr(pltpu.get_tpu_info(), "vmem_capacity_bytes", None)
        if cap:
            return int(cap)
    except Exception:
        pass
    return default  # conservative default if the query is unavailable


def _choose_tm(M, max_tm):
    """MXU/sublane-aligned M tile within the VMEM budget.

    Prefers the largest 256/128/16-aligned tile that divides M exactly (no M
    padding, no post-kernel slice) and keeps the grid at >= 2 steps when
    there is enough work to shard across both TensorCores (v7x megacore).
    """
    max_tm = max(16, min(int(max_tm), 2048)) // 16 * 16
    if M <= 256 and M <= max_tm:
        return _round_up(M, 16)            # tiny problem: one step is fine
    upper = min(max_tm, max(16, M // 2) if M >= 512 else M)
    for align in (256, 128, 16):
        t = (upper // align) * align
        while t >= align:
            if M % t == 0:
                return t
            t -= align
    # No aligned divisor of M: spread M as evenly as possible over the steps.
    steps = max(2, _cdiv(M, max(upper // 16 * 16, 16)))
    return _round_up(_cdiv(M, steps), 16)


def _resident_spec(shape, index_map, nbytes):
    """BlockSpec for a block whose index_map is constant over the grid.

    The pipeline never re-fetches it; when it is large, additionally drop the
    second (dead) VMEM buffer via pl.Buffered(1).  Guarded so older jax
    versions without pipeline_mode fall back to the default spec.
    """
    if nbytes >= _SINGLE_BUFFER_MIN_BYTES:
        try:
            return pl.BlockSpec(shape, index_map,
                                pipeline_mode=pl.Buffered(buffer_count=1))
        except (AttributeError, TypeError):
            pass
    return pl.BlockSpec(shape, index_map)


def _resident_w_kernel(a_ref, w_ref, b_ref, o_ref):
    """One (tm, K) x (K, Np) MXU dot per grid step; bias fused into the store."""
    acc = jnp.dot(a_ref[...], w_ref[...], preferred_element_type=jnp.float32)
    o_ref[...] = (acc + b_ref[...]).astype(o_ref.dtype)


def _k_grid_kernel(a_ref, w_ref, b_ref, o_ref, acc_ref):
    """Fallback for large K*E: K-reduction grid with an f32 accumulator."""
    @pl.when(pl.program_id(1) == 0)
    def _():
        acc_ref[...] = jnp.zeros_like(acc_ref)

    acc_ref[...] += jnp.dot(a_ref[...], w_ref[...],
                            preferred_element_type=jnp.float32)

    @pl.when(pl.program_id(1) == pl.num_programs(1) - 1)
    def _():
        o_ref[...] = (acc_ref[...] + b_ref[...]).astype(o_ref.dtype)


def patch_embed_matmul(a, w, b, *, out_dtype=jnp.bfloat16,
                       vmem_budget_bytes=None, force_k_grid=False):
    """Computes a @ w + b with a Pallas TPU kernel.

    a: (M, K)  patch matrix (bf16/f32).
    w: (K, N)  reshaped conv weight (same dtype as `a`).
    b: (1, N)  conv bias (f32; accumulation and bias add are f32).
    Returns (M, N) in `out_dtype`.
    """
    M, K = a.shape
    Kw, N = w.shape
    assert K == Kw and b.shape == (1, N), (a.shape, w.shape, b.shape)

    ab = jnp.dtype(a.dtype).itemsize
    ob = jnp.dtype(out_dtype).itemsize

    # Generation-aware VMEM budget (v5e/v6e: 128 MiB, v7x: 64 MiB per TC).
    vmem_cap = _vmem_capacity_bytes()
    limit_cap = min(vmem_cap - (16 << 20), 100 << 20)
    if vmem_budget_bytes is None:
        vmem_budget_bytes = min(int(vmem_cap * 0.75), limit_cap - (4 << 20))

    Kp = _round_up(K, 128)   # lane-aligned contraction dim (exact: zero pad)
    Np = _round_up(N, 128)   # lane-dense output (no masked partial stores)
    b_bytes = Np * 4

    # --- path selection: resident weight vs. K-reduction grid ---------------
    w_bytes = Kp * Np * ab
    w_spec = _resident_spec((Kp, Np), lambda i: (0, 0), w_bytes)
    w_single = getattr(w_spec, "pipeline_mode", None) is not None
    fixed = (1 if w_single else 2) * w_bytes + 2 * b_bytes
    per_row = 2 * Kp * ab + 2 * Np * ob          # double-buffered A / out tiles
    resident_ok = (not force_k_grid) and (fixed + 16 * per_row <= vmem_budget_bytes)

    if resident_ok:
        tk = Kp
        tm = _choose_tm(M, (vmem_budget_bytes - fixed) // per_row)
    else:
        # Fallback: tile K ("arbitrary" trailing axis) with an f32 accumulator.
        nk = _cdiv(Kp, 1024)
        tk = _round_up(_cdiv(Kp, nk), 128)
        Kp = _round_up(Kp, tk)
        fixed = 2 * tk * Np * ab + 2 * b_bytes
        per_row = 2 * tk * ab + 2 * Np * ob + Np * 4   # + f32 accumulator row
        tm = _choose_tm(M, (vmem_budget_bytes - fixed) // per_row)
        # TODO(synk): also tile N (column blocks) for extremely large embed_dim.

    Mp = _round_up(M, tm)

    # Zero padding is exact: padded K columns carry zero weight, padded N
    # columns carry zero weight/bias, padded M rows are sliced off.
    if Kp != K or Mp != M:
        a = jnp.pad(a, ((0, Mp - M), (0, Kp - K)))   # fuses with the relayout
    if Kp != K or Np != N:
        w = jnp.pad(w, ((0, Kp - K), (0, Np - N)))
    if Np != N:
        b = jnp.pad(b, ((0, 0), (0, Np - N)))
    b = b.astype(jnp.float32)

    footprint = fixed + tm * per_row
    vmem_limit = int(min(max(footprint + (8 << 20), 32 << 20), limit_cap))

    if resident_ok:
        grid = (Mp // tm,)
        in_specs = [
            pl.BlockSpec((tm, Kp), lambda i: (i, 0)),             # A: streamed
            w_spec,                                               # W: resident
            _resident_spec((1, Np), lambda i: (0, 0), b_bytes),   # bias: resident
        ]
        out_specs = pl.BlockSpec((tm, Np), lambda i: (i, 0))
        kernel = _resident_w_kernel
        scratch = []
        dims = ("parallel",)
    else:
        grid = (Mp // tm, Kp // tk)
        in_specs = [
            pl.BlockSpec((tm, tk), lambda i, k: (i, k)),
            pl.BlockSpec((tk, Np), lambda i, k: (k, 0)),
            pl.BlockSpec((1, Np), lambda i, k: (0, 0)),
        ]
        out_specs = pl.BlockSpec((tm, Np), lambda i, k: (i, 0))
        kernel = _k_grid_kernel
        scratch = [pltpu.VMEM((tm, Np), jnp.float32)]
        dims = ("parallel", "arbitrary")

    out = pl.pallas_call(
        kernel,
        out_shape=jax.ShapeDtypeStruct((Mp, Np), out_dtype),
        grid_spec=pltpu.PrefetchScalarGridSpec(
            num_scalar_prefetch=0,
            grid=grid,
            in_specs=in_specs,
            out_specs=out_specs,
            scratch_shapes=scratch,
        ),
        compiler_params=pltpu.CompilerParams(
            dimension_semantics=dims,
            vmem_limit_bytes=vmem_limit,
        ),
    )(a, w, b)

    if Mp != M or Np != N:
        out = out[:M, :N]
    return out


def patch_embed_3d(x, weight, bias, kernel_size, *, compute_dtype=jnp.bfloat16,
                   out_dtype=jnp.bfloat16, force_k_grid=False):
    """Forward pass of PatchEmbed3D.

    x:      (B, C, D, H, W)             NCDHW, as taken by PyTorch Conv3d.
    weight: (embed_dim, C, kd, kh, kw)  PyTorch Conv3d weight layout.
    bias:   (embed_dim,)
    Returns (B, D//kd, H//kh, W//kw, embed_dim) in `out_dtype`.

    Inputs are cast to `compute_dtype` (bf16) and the output is stored in
    `out_dtype` (bf16 by default, halving the dominant output HBM stream);
    the MXU accumulation and bias add are f32.  Pass out_dtype=x.dtype to
    match the PyTorch module's output dtype exactly.
    """
    kd, kh, kw = kernel_size
    B, C, D, H, W = x.shape
    E = weight.shape[0]
    # Conv3d with stride == kernel and no padding floor-truncates ragged edges.
    Dp, Hp, Wp = D // kd, H // kh, W // kw
    if (Dp * kd, Hp * kh, Wp * kw) != (D, H, W):
        x = x[:, :, :Dp * kd, :Hp * kh, :Wp * kw]

    # Patch extraction (layout glue).  Done in bf16 so the XLA relayout and
    # the kernel's A stream both move half the bytes.
    # TODO(synk): fuse this relayout into the kernel. The natural per-step x
    # block (C, kd, kh, Wp, kw) needs a lane-size-changing reshuffle to
    # (Wp, C*kd*kh*kw) before the dot, which Mosaic either rejects or lowers
    # to per-(c,zd,zh) sub-lane stores / tiny DMAs that cost more than one
    # extra bf16 HBM pass over x.  Revisit with a DMA-side gather.
    xp = x.astype(compute_dtype).reshape(B, C, Dp, kd, Hp, kh, Wp, kw)
    xp = xp.transpose(0, 2, 4, 6, 1, 3, 5, 7)
    a = xp.reshape(B * Dp * Hp * Wp, C * kd * kh * kw)                # (M, K)

    # Conv weight -> matmul weight, matching the (C, kd, kh, kw) patch order.
    w = weight.reshape(E, C * kd * kh * kw).T.astype(compute_dtype)   # (K, E)
    b = bias.reshape(1, E).astype(jnp.float32)                        # (1, E)

    out = patch_embed_matmul(a, w, b, out_dtype=out_dtype,
                             force_k_grid=force_k_grid)               # (M, E)
    return out.reshape(B, Dp, Hp, Wp, E)


if __name__ == "__main__":
    # Small configuration: in_chans=4, embed_dim=32, kernel=stride=(8,8,8),
    # input spatial 16^3.
    B, C, D, H, W = 2, 4, 16, 16, 16
    kernel_size = (8, 8, 8)
    embed_dim = 32

    key = jax.random.PRNGKey(0)
    kx, kw_, kb = jax.random.split(key, 3)
    x = jax.random.normal(kx, (B, C, D, H, W), dtype=jnp.float32)
    weight = jax.random.normal(
        kw_, (embed_dim, C) + kernel_size, dtype=jnp.float32) * 0.02
    bias = jax.random.normal(kb, (embed_dim,), dtype=jnp.float32) * 0.02

    # Reference: plain f32 conv + permute (same semantics as PyTorch module).
    ref = jax.lax.conv_general_dilated(
        x, weight, window_strides=kernel_size, padding="VALID",
        dimension_numbers=("NCDHW", "OIDHW", "NCDHW"),
    ) + bias[None, :, None, None, None]
    ref = jnp.transpose(ref, (0, 2, 3, 4, 1))

    Dp, Hp, Wp = D // 8, H // 8, W // 8

    # 1) Default path: resident weight, bf16 output.
    fn = jax.jit(functools.partial(patch_embed_3d, kernel_size=kernel_size))
    out = jax.block_until_ready(fn(x, weight, bias))
    assert out.shape == (B, Dp, Hp, Wp, embed_dim), out.shape
    assert out.dtype == jnp.bfloat16, out.dtype
    err = float(jnp.max(jnp.abs(out.astype(jnp.float32) - ref)))
    assert err < 1e-1, f"resident-W path max err {err}"

    # 2) K-reduction fallback path (exercised explicitly), f32 output.
    fn_k = jax.jit(functools.partial(patch_embed_3d, kernel_size=kernel_size,
                                     out_dtype=jnp.float32, force_k_grid=True))
    out_k = jax.block_until_ready(fn_k(x, weight, bias))
    assert out_k.shape == ref.shape and out_k.dtype == jnp.float32
    err_k = float(jnp.max(jnp.abs(out_k - ref)))
    assert err_k < 1e-1, f"K-grid fallback path max err {err_k}"

    print("KERNEL_OK")
</pallas_src>

<mosaic_0001>
module attributes {stable_mosaic.version = 11 : i64} {
  func.func @_resident_w_kernel(%arg0: i32, %arg1: memref<16x2048xbf16, #tpu.memory_space<vmem>>, %arg2: memref<2048x128xbf16, #tpu.memory_space<vmem>>, %arg3: memref<1x128xf32, #tpu.memory_space<vmem>>, %arg4: memref<16x128xbf16, #tpu.memory_space<vmem>>) attributes {dimension_semantics = [#tpu.dimension_semantics<parallel>], iteration_bounds = array<i64: 1>, scalar_prefetch = 0 : i64, scratch_operands = 0 : i64, tpu.core_type = #tpu.core_type<tc>, window_params = [{transform_indices = @transform_0, window_bounds = array<i64: 16, 2048>}, {pipeline_mode = #tpu.pipeline_mode<synchronous>, transform_indices = @transform_1, window_bounds = array<i64: 2048, 128>}, {pipeline_mode = #tpu.pipeline_mode<synchronous>, transform_indices = @transform_2, window_bounds = array<i64: 1, 128>}, {transform_indices = @transform_3, window_bounds = array<i64: 16, 128>}]} {
    %c0 = arith.constant 0 : index
    %c0_0 = arith.constant 0 : index
    %0 = vector.load %arg1[%c0, %c0_0] : memref<16x2048xbf16, #tpu.memory_space<vmem>>, vector<16x2048xbf16>
    %c0_1 = arith.constant 0 : index
    %c0_2 = arith.constant 0 : index
    %1 = vector.load %arg2[%c0_1, %c0_2] : memref<2048x128xbf16, #tpu.memory_space<vmem>>, vector<2048x128xbf16>
    %cst = arith.constant dense<0.000000e+00> : vector<16x128xf32>
    %2 = tpu.matmul %0, %1, %cst {dimension_numbers = #tpu.dot_dimension_numbers<[1], [0], [0], [1], [0, 0, 1, 1], [], []>} : vector<16x2048xbf16>, vector<2048x128xbf16>, vector<16x128xf32> -> vector<16x128xf32>
    %c0_3 = arith.constant 0 : index
    %c0_4 = arith.constant 0 : index
    %3 = vector.load %arg3[%c0_3, %c0_4] : memref<1x128xf32, #tpu.memory_space<vmem>>, vector<1x128xf32>
    %4 = vector.broadcast %3 : vector<1x128xf32> to vector<16x128xf32>
    %5 = arith.addf %2, %4 : vector<16x128xf32>
    %6 = arith.truncf %5 : vector<16x128xf32> to vector<16x128xbf16>
    %c0_5 = arith.constant 0 : index
    %c0_6 = arith.constant 0 : index
    %7 = vector.load %arg4[%c0_5, %c0_6] : memref<16x128xbf16, #tpu.memory_space<vmem>>, vector<16x128xbf16>
    tpu.vector_store %arg4[%c0_5, %c0_6], %6 {strides = array<i32>} : memref<16x128xbf16, #tpu.memory_space<vmem>>, vector<16x128xbf16>,
    return
  }
  func.func @transform_0(%arg0: i32) -> (i32, i32) {
    %c0_i32 = arith.constant 0 : i32
    %c0_i32_0 = arith.constant 0 : i32
    return %arg0, %c0_i32 : i32, i32
  }
  func.func @transform_1(%arg0: i32) -> (i32, i32) {
    %c0_i32 = arith.constant 0 : i32
    %c0_i32_0 = arith.constant 0 : i32
    %c0_i32_1 = arith.constant 0 : i32
    return %c0_i32, %c0_i32_0 : i32, i32
  }
  func.func @transform_2(%arg0: i32) -> (i32, i32) {
    %c0_i32 = arith.constant 0 : i32
    %c0_i32_0 = arith.constant 0 : i32
    %c0_i32_1 = arith.constant 0 : i32
    return %c0_i32, %c0_i32_0 : i32, i32
  }
  func.func @transform_3(%arg0: i32) -> (i32, i32) {
    %c0_i32 = arith.constant 0 : i32
    %c0_i32_0 = arith.constant 0 : i32
    return %arg0, %c0_i32 : i32, i32
  }
}

</mosaic_0001>

<bundles_post_ra>
// kernel: patch_embed_3d.1
= control target key start
LH: loop header
LB: loop body
LE: loop exit
PB: predicated region body
PF: predicated region fallthrough
CT: control target
= control target key end

     0   :  { %s2441_s0 = inlined_call_operand.vmem [shape: bf16[16,2048], index: 0, kind: input, shape index: {}]   ;;  %s2442_s1 = inlined_call_operand.vmem [shape: bf16[2048,128], index: 1, kind: input, shape index: {}]   ;;  %s2443_s2 = inlined_call_operand.vmem [shape: f32[1,128], index: 2, kind: input, shape index: {}]   ;;  %s2444_s3 = inlined_call_operand.hbm [shape: bf16[16,128], index: 3, kind: output, shape index: {}]  }
   0x1   :  { %v1830_v0 = vld [vmem:[%s2442_s1 + $0x78] sm:$0xff]   ;;  %v1834_v4 = vld [vmem:[%s2442_s1 + $0x70] sm:$0xff]   ;;  %v1838_v8 = vld [vmem:[%s2442_s1 + $0x68] sm:$0xff]  }
   0x2   :  { %v1831_v1 = vld [vmem:[%s2442_s1 + $0xf8] sm:$0xff]   ;;  %1651 = vmatprep.subr.bf16.mxu0 %v1830_v0  ;;  %v1835_v5 = vld [vmem:[%s2442_s1 + $0xf0] sm:$0xff]   ;;  %v1839_v9 = vld [vmem:[%s2442_s1 + $0xe8] sm:$0xff]  }
   0x3   :  { %v1832_v2 = vld [vmem:[%s2442_s1 + $0x38] sm:$0xff]   ;;  %1673 = vmatprep.subr.bf16.mxu1 %v1831_v1  ;;  %v1836_v6 = vld [vmem:[%s2442_s1 + $0x30] sm:$0xff]   ;;  %v1840_v10 = vld [vmem:[%s2442_s1 + $0x28] sm:$0xff]  }
   0x4   :  { %v1833_v3 = vld [vmem:[%s2442_s1 + $0xb8] sm:$0xff]   ;;  %1652 = vmatpush3.bf16.msra.mxu0 %v1832_v2  ;;  %v1837_v7 = vld [vmem:[%s2442_s1 + $0xb0] sm:$0xff]   ;;  %v1841_v11 = vld [vmem:[%s2442_s1 + $0xa8] sm:$0xff]  }
   0x5   :  { %1674 = vmatpush3.bf16.msra.mxu1 %v1833_v3  ;;  %1653 = vmatprep.subr.bf16.mxu0 %v1834_v4  ;;  %v1842_v12 = vld [vmem:[%s2442_s1 + $0x60] sm:$0xff]   ;;  %v1846_v16 = vld [vmem:[%s2442_s1 + $0x58] sm:$0xff]   ;;  %v1850_v20 = vld [vmem:[%s2442_s1 + $0x50] sm:$0xff]  }
   0x6   :  { %1675 = vmatprep.subr.bf16.mxu1 %v1835_v5  ;;  %v1843_v13 = vld [vmem:[%s2442_s1 + $0xe0] sm:$0xff]   ;;  %v1847_v17 = vld [vmem:[%s2442_s1 + $0xd8] sm:$0xff]   ;;  %v1851_v21 = vld [vmem:[%s2442_s1 + $0xd0] sm:$0xff]  }
   0x7   :  { %v1844_v14 = vld [vmem:[%s2442_s1 + $0x20] sm:$0xff]   ;;  %v1848_v18 = vld [vmem:[%s2442_s1 + $0x18] sm:$0xff]   ;;  %v1852_v22 = vld [vmem:[%s2442_s1 + $0x10] sm:$0xff]  }
   0x8   :  { %1654 = vmatpush3.bf16.msra.mxu0 %v1836_v6  ;;  %v1845_v15 = vld [vmem:[%s2442_s1 + $0xa0] sm:$0xff]   ;;  %v1849_v19 = vld [vmem:[%s2442_s1 + $0x98] sm:$0xff]   ;;  %v1853_v23 = vld [vmem:[%s2442_s1 + $0x90] sm:$0xff]  }
   0x9   :  { %1676 = vmatpush3.bf16.msra.mxu1 %v1837_v7  ;;  %1655 = vmatprep.subr.bf16.mxu0 %v1838_v8  ;;  %v1854_v24 = vld [vmem:[%s2442_s1 + $0x48] sm:$0xff]   ;;  %v1858_v28 = vld [vmem:[%s2442_s1 + $0x40] sm:$0xff]   ;;  %v1862_v40 = vld [vmem:[%s2442_s1 + $0x178] sm:$0xff]  }
   0xa   :  { %1677 = vmatprep.subr.bf16.mxu1 %v1839_v9  ;;  %v1855_v25 = vld [vmem:[%s2442_s1 + $0xc8] sm:$0xff]   ;;  %v1859_v29 = vld [vmem:[%s2442_s1 + $0xc0] sm:$0xff]   ;;  %v1863_v41 = vld [vmem:[%s2442_s1 + $0x1f8] sm:$0xff]  }
   0xb   :  { %v1856_v26 = vld [vmem:[%s2442_s1 + $0x8] sm:$0xff]   ;;  %v1860_v30 = vld [vmem:[%s2442_s1] sm:$0xff]   ;;  %v1864_v42 = vld [vmem:[%s2442_s1 + $0x138] sm:$0xff]  }
   0xc   :  { %1656 = vmatpush3.bf16.msra.mxu0 %v1840_v10  ;;  %v1857_v27 = vld [vmem:[%s2442_s1 + $0x88] sm:$0xff]   ;;  %v1861_v31 = vld [vmem:[%s2442_s1 + $0x80] sm:$0xff]   ;;  %v1865_v43 = vld [vmem:[%s2442_s1 + $0x1b8] sm:$0xff]  }
   0xd   :  { %1678 = vmatpush3.bf16.msra.mxu1 %v1841_v11  ;;  %1657 = vmatprep.subr.bf16.mxu0 %v1842_v12  ;;  %v16_v32 = vld [vmem:[%s2441_s0] sm:$0xff]  ;;  %v17_v34 = vld [vmem:[%s2441_s0 + $0x8] sm:$0xff]  ;;  %v1866_v44 = vld [vmem:[%s2442_s1 + $0x170] sm:$0xff]  }
   0xe   :  { %1679 = vmatprep.subr.bf16.mxu1 %v1843_v13  ;;  %v24_v33 = vld [vmem:[%s2441_s0 + $0x40] sm:$0xff]  ;;  %v25_v37 = vld [vmem:[%s2441_s0 + $0x48] sm:$0xff]  ;;  %v1867_v45 = vld [vmem:[%s2442_s1 + $0x1f0] sm:$0xff]  }
   0xf   :  { %v1498_v35 = vcombine.low %v16_v32, %v24_v33  ;;  %v1499_v36 = vcombine.high %v16_v32, %v24_v33  ;;  %v1500_v38 = vcombine.low %v17_v34, %v25_v37  ;;  %v1501_v39 = vcombine.high %v17_v34, %v25_v37  ;;  %v1868_v46 = vld [vmem:[%s2442_s1 + $0x130] sm:$0xff]   ;;  %v1870_v48 = vld [vmem:[%s2442_s1 + $0x168] sm:$0xff]   ;;  %v1874_v52 = vld [vmem:[%s2442_s1 + $0x160] sm:$0xff]  }
  0x10   :  { %1658 = vmatpush3.bf16.msra.mxu0 %v1844_v14  ;;  %v1869_v47 = vld [vmem:[%s2442_s1 + $0x1b0] sm:$0xff]   ;;  %v1871_v49 = vld [vmem:[%s2442_s1 + $0x1e8] sm:$0xff]   ;;  %v1875_v53 = vld [vmem:[%s2442_s1 + $0x1e0] sm:$0xff]  }
  0x11   :  { %1680 = vmatpush3.bf16.msra.mxu1 %v1845_v15  ;;  %1659 = vmatprep.subr.bf16.mxu0 %v1846_v16  ;;  %v1872_v50 = vld [vmem:[%s2442_s1 + $0x128] sm:$0xff]   ;;  %v1876_v54 = vld [vmem:[%s2442_s1 + $0x120] sm:$0xff]   ;;  %v1878_v56 = vld [vmem:[%s2442_s1 + $0x158] sm:$0xff]  }
  0x12   :  { %1681 = vmatprep.subr.bf16.mxu1 %v1847_v17  ;;  %1175 = vmatprep.mubr.bf16.mxu0 %v1499_v36  ;;  %v1873_v51 = vld [vmem:[%s2442_s1 + $0x1a8] sm:$0xff]   ;;  %v1877_v55 = vld [vmem:[%s2442_s1 + $0x1a0] sm:$0xff]   ;;  %v1879_v57 = vld [vmem:[%s2442_s1 + $0x1d8] sm:$0xff]  }
  0x13   :  { %1216 = vmatprep.mubr.bf16.mxu1 %v1501_v39  ;;  %v1880_v58 = vld [vmem:[%s2442_s1 + $0x118] sm:$0xff]   ;;  %v1882_v60 = vld [vmem:[%s2442_s1 + $0x150] sm:$0xff]   ;;  %v1886_v0 = vld [vmem:[%s2442_s1 + $0x148] sm:$0xff]  }
  0x14   :  { %1660 = vmatpush3.bf16.msra.mxu0 %v1848_v18  ;;  %v1881_v59 = vld [vmem:[%s2442_s1 + $0x198] sm:$0xff]   ;;  %v1883_v61 = vld [vmem:[%s2442_s1 + $0x1d0] sm:$0xff]   ;;  %v1887_v1 = vld [vmem:[%s2442_s1 + $0x1c8] sm:$0xff]  }
  0x15   :  { %1682 = vmatpush3.bf16.msra.mxu1 %v1849_v19  ;;  %1661 = vmatprep.subr.bf16.mxu0 %v1850_v20  ;;  %v1884_v62 = vld [vmem:[%s2442_s1 + $0x110] sm:$0xff]   ;;  %v1888_v2 = vld [vmem:[%s2442_s1 + $0x108] sm:$0xff]   ;;  %v1890_v4 = vld [vmem:[%s2442_s1 + $0x140] sm:$0xff]  }
  0x16   :  { %1683 = vmatprep.subr.bf16.mxu1 %v1851_v21  ;;  %v1885_v63 = vld [vmem:[%s2442_s1 + $0x190] sm:$0xff]   ;;  %v1889_v3 = vld [vmem:[%s2442_s1 + $0x188] sm:$0xff]   ;;  %v1891_v5 = vld [vmem:[%s2442_s1 + $0x1c0] sm:$0xff]  }
  0x17   :  { %v1892_v6 = vld [vmem:[%s2442_s1 + $0x100] sm:$0xff]   ;;  %v18_v8 = vld [vmem:[%s2441_s0 + $0x10] sm:$0xff]  ;;  %v19_v12 = vld [vmem:[%s2441_s0 + $0x18] sm:$0xff] }
  0x18   :  { %1662 = vmatpush3.bf16.msra.mxu0 %v1852_v22  ;;  %v1893_v7 = vld [vmem:[%s2442_s1 + $0x180] sm:$0xff]   ;;  %v26_v9 = vld [vmem:[%s2441_s0 + $0x50] sm:$0xff]  ;;  %v27_v13 = vld [vmem:[%s2441_s0 + $0x58] sm:$0xff] }
  0x19   :  { %1684 = vmatpush3.bf16.msra.mxu1 %v1853_v23  ;;  %1663 = vmatprep.subr.bf16.mxu0 %v1854_v24  ;;  %v1502_v10 = vcombine.low %v18_v8, %v26_v9  ;;  %v1503_v11 = vcombine.high %v18_v8, %v26_v9  ;;  %v1504_v14 = vcombine.low %v19_v12, %v27_v13  ;;  %v1894_v16 = vld [vmem:[%s2442_s1 + $0x278] sm:$0xff]   ;;  %v1898_v20 = vld [vmem:[%s2442_s1 + $0x270] sm:$0xff]   ;;  %v1902_v24 = vld [vmem:[%s2442_s1 + $0x268] sm:$0xff]  }
  0x1a   :  { %1685 = vmatprep.subr.bf16.mxu1 %v1855_v25  ;;  %v1505_v15 = vcombine.high %v19_v12, %v27_v13  ;;  %v1895_v17 = vld [vmem:[%s2442_s1 + $0x2f8] sm:$0xff]   ;;  %v1899_v21 = vld [vmem:[%s2442_s1 + $0x2f0] sm:$0xff]   ;;  %v1903_v25 = vld [vmem:[%s2442_s1 + $0x2e8] sm:$0xff]  }
  0x1b   :  { %v1896_v18 = vld [vmem:[%s2442_s1 + $0x238] sm:$0xff]   ;;  %v1900_v22 = vld [vmem:[%s2442_s1 + $0x230] sm:$0xff]  }
  0x1c   :  { %1664 = vmatpush3.bf16.msra.mxu0 %v1856_v26  ;;  %v1897_v19 = vld [vmem:[%s2442_s1 + $0x2b8] sm:$0xff]   ;;  %v1901_v23 = vld [vmem:[%s2442_s1 + $0x2b0] sm:$0xff]   ;;  %v1904_v26 = vld [vmem:[%s2442_s1 + $0x228] sm:$0xff]  }
  0x1d   :  { %1686 = vmatpush3.bf16.msra.mxu1 %v1857_v27  ;;  %1665 = vmatprep.subr.bf16.mxu0 %v1858_v28  ;;  %v1905_v27 = vld [vmem:[%s2442_s1 + $0x2a8] sm:$0xff]   ;;  %v1906_v28 = vld [vmem:[%s2442_s1 + $0x260] sm:$0xff]   ;;  %v1910_v32 = vld [vmem:[%s2442_s1 + $0x258] sm:$0xff]  }
  0x1e   :  { %1687 = vmatprep.subr.bf16.mxu1 %v1859_v29  ;;  %v1907_v29 = vld [vmem:[%s2442_s1 + $0x2e0] sm:$0xff]   ;;  %v1911_v33 = vld [vmem:[%s2442_s1 + $0x2d8] sm:$0xff]   ;;  %v1914_v36 = vld [vmem:[%s2442_s1 + $0x250] sm:$0xff]  }
  0x1f   :  { %v1912_v34 = vld [vmem:[%s2442_s1 + $0x218] sm:$0xff]   ;;  %v1915_v37 = vld [vmem:[%s2442_s1 + $0x2d0] sm:$0xff]  }
  0x20   :  { %1666 = vmatpush3.bf16.msra.mxu0 %v1860_v30  ;;  %v1908_v30 = vld [vmem:[%s2442_s1 + $0x220] sm:$0xff]   ;;  %v1917_v39 = vld [vmem:[%s2442_s1 + $0x290] sm:$0xff]   ;;  %v1942_v8 = vld [vmem:[%s2442_s1 + $0x358] sm:$0xff]  }
  0x21   :  { %1688 = vmatpush3.bf16.msra.mxu1 %v1861_v31  ;;  %1695 = vmatprep.subr.bf16.mxu0 %v1862_v40  ;;  %v1909_v31 = vld [vmem:[%s2442_s1 + $0x2a0] sm:$0xff]   ;;  %v1918_v40 = vld [vmem:[%s2442_s1 + $0x248] sm:$0xff]   ;;  %v1943_v9 = vld [vmem:[%s2442_s1 + $0x3d8] sm:$0xff]  }
  0x22   :  { %1717 = vmatprep.subr.bf16.mxu1 %v1863_v41  ;;  %v1919_v41 = vld [vmem:[%s2442_s1 + $0x2c8] sm:$0xff]   ;;  %v1946_v12 = vld [vmem:[%s2442_s1 + $0x350] sm:$0xff]  }
  0x23   :  { %1176 = vmatmul.mubr.bf16.vlgmr.msra.gmra.mxu0 %v1498_v35  ;;  %v1913_v35 = vld [vmem:[%s2442_s1 + $0x298] sm:$0xff]   ;;  %v1947_v13 = vld [vmem:[%s2442_s1 + $0x3d0] sm:$0xff]  }
  0x24   :  { %1217 = vmatmul.mubr.bf16.vlgmr.msra.gmra.mxu1 %v1500_v38  ;;  %1696 = vmatpush3.bf16.msra.mxu0 %v1864_v42  ;;  %v1916_v38 = vld [vmem:[%s2442_s1 + $0x210] sm:$0xff]   ;;  %v1920_v42 = vld [vmem:[%s2442_s1 + $0x208] sm:$0xff]  }
  0x25   :  { %1718 = vmatpush3.bf16.msra.mxu1 %v1865_v43  ;;  %1697 = vmatprep.subr.bf16.mxu0 %v1866_v44  ;;  %v1921_v43 = vld [vmem:[%s2442_s1 + $0x288] sm:$0xff]   ;;  %v1922_v44 = vld [vmem:[%s2442_s1 + $0x240] sm:$0xff]  }
  0x26   :  { %1719 = vmatprep.subr.bf16.mxu1 %v1867_v45  ;;  %1257 = vmatprep.mubr.bf16.mxu0 %v1503_v11  ;;  %v1923_v45 = vld [vmem:[%s2442_s1 + $0x2c0] sm:$0xff]   ;;  %v1945_v11 = vld [vmem:[%s2442_s1 + $0x398] sm:$0xff]  }
  0x27   :  { %1298 = vmatprep.mubr.bf16.mxu1 %v1505_v15  ;;  %v1949_v15 = vld [vmem:[%s2442_s1 + $0x390] sm:$0xff]  }
  0x28   :  { %1698 = vmatpush3.bf16.msra.mxu0 %v1868_v46  ;;  %v1924_v46 = vld [vmem:[%s2442_s1 + $0x200] sm:$0xff]  }
  0x29   :  { %1720 = vmatpush3.bf16.msra.mxu1 %v1869_v47  ;;  %1699 = vmatprep.subr.bf16.mxu0 %v1870_v48  ;;  %v1925_v47 = vld [vmem:[%s2442_s1 + $0x280] sm:$0xff]  }
  0x2a   :  { %1721 = vmatprep.subr.bf16.mxu1 %v1871_v49  ;;  %v20_v48 = vld [vmem:[%s2441_s0 + $0x20] sm:$0xff] }
  0x2b   :  { %v28_v49 = vld [vmem:[%s2441_s0 + $0x60] sm:$0xff] }
  0x2c   :  { %1700 = vmatpush3.bf16.msra.mxu0 %v1872_v50  ;;  %v21_v50 = vld [vmem:[%s2441_s0 + $0x28] sm:$0xff] }
  0x2d   :  { %1722 = vmatpush3.bf16.msra.mxu1 %v1873_v51  ;;  %1701 = vmatprep.subr.bf16.mxu0 %v1874_v52  ;;  %v29_v51 = vld [vmem:[%s2441_s0 + $0x68] sm:$0xff]  ;;  %v1506_v52 = vcombine.low %v20_v48, %v28_v49 }
  0x2e   :  { %1723 = vmatprep.subr.bf16.mxu1 %v1875_v53  ;;  %v1507_v53 = vcombine.high %v20_v48, %v28_v49 }
  0x30   :  { %1702 = vmatpush3.bf16.msra.mxu0 %v1876_v54  ;;  %v1508_v54 = vcombine.low %v21_v50, %v29_v51 }
  0x31   :  { %1724 = vmatpush3.bf16.msra.mxu1 %v1877_v55  ;;  %1703 = vmatprep.subr.bf16.mxu0 %v1878_v56  ;;  %v1509_v55 = vcombine.high %v21_v50, %v29_v51  ;;  %v1926_v56 = vld [vmem:[%s2442_s1 + $0x378] sm:$0xff]  }
  0x32   :  { %1725 = vmatprep.subr.bf16.mxu1 %v1879_v57  ;;  %v1927_v57 = vld [vmem:[%s2442_s1 + $0x3f8] sm:$0xff]  }
  0x34   :  { %1704 = vmatpush3.bf16.msra.mxu0 %v1880_v58  ;;  %v1928_v58 = vld [vmem:[%s2442_s1 + $0x338] sm:$0xff]  }
  0x35   :  { %1726 = vmatpush3.bf16.msra.mxu1 %v1881_v59  ;;  %1705 = vmatprep.subr.bf16.mxu0 %v1882_v60  ;;  %v1929_v59 = vld [vmem:[%s2442_s1 + $0x3b8] sm:$0xff]   ;;  %v1930_v60 = vld [vmem:[%s2442_s1 + $0x370] sm:$0xff]  }
  0x36   :  { %1727 = vmatprep.subr.bf16.mxu1 %v1883_v61  ;;  %v1931_v61 = vld [vmem:[%s2442_s1 + $0x3f0] sm:$0xff]  }
  0x38   :  { %1706 = vmatpush3.bf16.msra.mxu0 %v1884_v62  ;;  %v1932_v62 = vld [vmem:[%s2442_s1 + $0x330] sm:$0xff]  }
  0x39   :  { %1728 = vmatpush3.bf16.msra.mxu1 %v1885_v63  ;;  %1707 = vmatprep.subr.bf16.mxu0 %v1886_v0  ;;  %v1933_v63 = vld [vmem:[%s2442_s1 + $0x3b0] sm:$0xff]   ;;  %v1934_v0 = vld [vmem:[%s2442_s1 + $0x368] sm:$0xff]  }
  0x3a   :  { %1729 = vmatprep.subr.bf16.mxu1 %v1887_v1  ;;  %v1935_v1 = vld [vmem:[%s2442_s1 + $0x3e8] sm:$0xff]  }
  0x3c   :  { %1708 = vmatpush3.bf16.msra.mxu0 %v1888_v2  ;;  %v1936_v2 = vld [vmem:[%s2442_s1 + $0x328] sm:$0xff]  }
  0x3d   :  { %1730 = vmatpush3.bf16.msra.mxu1 %v1889_v3  ;;  %1709 = vmatprep.subr.bf16.mxu0 %v1890_v4  ;;  %v1937_v3 = vld [vmem:[%s2442_s1 + $0x3a8] sm:$0xff]   ;;  %v1938_v4 = vld [vmem:[%s2442_s1 + $0x360] sm:$0xff]  }
  0x3e   :  { %1731 = vmatprep.subr.bf16.mxu1 %v1891_v5  ;;  %v1939_v5 = vld [vmem:[%s2442_s1 + $0x3e0] sm:$0xff]  }
  0x40   :  { %1710 = vmatpush3.bf16.msra.mxu0 %v1892_v6  ;;  %v1940_v6 = vld [vmem:[%s2442_s1 + $0x320] sm:$0xff]  }
  0x41   :  { %1732 = vmatpush3.bf16.msra.mxu1 %v1893_v7  ;;  %1739 = vmatprep.subr.bf16.mxu0 %v1894_v16  ;;  %v1941_v7 = vld [vmem:[%s2442_s1 + $0x3a0] sm:$0xff]   ;;  %v1950_v16 = vld [vmem:[%s2442_s1 + $0x348] sm:$0xff]  }
  0x42   :  { %1761 = vmatprep.subr.bf16.mxu1 %v1895_v17  ;;  %v1951_v17 = vld [vmem:[%s2442_s1 + $0x3c8] sm:$0xff]  }
  0x43   :  { %1258 = vmatmul.mubr.bf16.vlgmr.msra.gmra.mxu0 %v1502_v10  ;;  %v1944_v10 = vld [vmem:[%s2442_s1 + $0x318] sm:$0xff]  }
  0x44   :  { %1299 = vmatmul.mubr.bf16.vlgmr.msra.gmra.mxu1 %v1504_v14  ;;  %1740 = vmatpush3.bf16.msra.mxu0 %v1896_v18  ;;  %v1948_v14 = vld [vmem:[%s2442_s1 + $0x310] sm:$0xff]   ;;  %v1952_v18 = vld [vmem:[%s2442_s1 + $0x308] sm:$0xff]  }
  0x45   :  { %1762 = vmatpush3.bf16.msra.mxu1 %v1897_v19  ;;  %1741 = vmatprep.subr.bf16.mxu0 %v1898_v20  ;;  %v1953_v19 = vld [vmem:[%s2442_s1 + $0x388] sm:$0xff]   ;;  %v1954_v20 = vld [vmem:[%s2442_s1 + $0x340] sm:$0xff]  }
  0x46   :  { %1763 = vmatprep.subr.bf16.mxu1 %v1899_v21  ;;  %1339 = vmatprep.mubr.bf16.mxu0 %v1507_v53  ;;  %v1955_v21 = vld [vmem:[%s2442_s1 + $0x3c0] sm:$0xff]  }
  0x47   :  { %1380 = vmatprep.mubr.bf16.mxu1 %v1509_v55 }
  0x48   :  { %1742 = vmatpush3.bf16.msra.mxu0 %v1900_v22  ;;  %v1956_v22 = vld [vmem:[%s2442_s1 + $0x300] sm:$0xff]  }
  0x49   :  { %1764 = vmatpush3.bf16.msra.mxu1 %v1901_v23  ;;  %1743 = vmatprep.subr.bf16.mxu0 %v1902_v24  ;;  %v1957_v23 = vld [vmem:[%s2442_s1 + $0x380] sm:$0xff]   ;;  %v22_v24 = vld [vmem:[%s2441_s0 + $0x30] sm:$0xff] }
  0x4a   :  { %1765 = vmatprep.subr.bf16.mxu1 %v1903_v25  ;;  %v30_v25 = vld [vmem:[%s2441_s0 + $0x70] sm:$0xff] }
  0x4c   :  { %1744 = vmatpush3.bf16.msra.mxu0 %v1904_v26  ;;  %v23_v26 = vld [vmem:[%s2441_s0 + $0x38] sm:$0xff] }
  0x4d   :  { %1766 = vmatpush3.bf16.msra.mxu1 %v1905_v27  ;;  %1745 = vmatprep.subr.bf16.mxu0 %v1906_v28  ;;  %v1510_v27 = vcombine.low %v22_v24, %v30_v25  ;;  %v1511_v28 = vcombine.high %v22_v24, %v30_v25 }
  0x4e   :  { %1767 = vmatprep.subr.bf16.mxu1 %v1907_v29  ;;  %v31_v29 = vld [vmem:[%s2441_s0 + $0x78] sm:$0xff] }
  0x50   :  { %1746 = vmatpush3.bf16.msra.mxu0 %v1908_v30 }
  0x51   :  { %1768 = vmatpush3.bf16.msra.mxu1 %v1909_v31  ;;  %1747 = vmatprep.subr.bf16.mxu0 %v1910_v32 }
  0x52   :  { %1769 = vmatprep.subr.bf16.mxu1 %v1911_v33 }
  0x54   :  { %1748 = vmatpush3.bf16.msra.mxu0 %v1912_v34 }
  0x55   :  { %1770 = vmatpush3.bf16.msra.mxu1 %v1913_v35  ;;  %1749 = vmatprep.subr.bf16.mxu0 %v1914_v36 }
  0x56   :  { %1771 = vmatprep.subr.bf16.mxu1 %v1915_v37 }
  0x58   :  { %1750 = vmatpush3.bf16.msra.mxu0 %v1916_v38 }
  0x59   :  { %1772 = vmatpush3.bf16.msra.mxu1 %v1917_v39  ;;  %1751 = vmatprep.subr.bf16.mxu0 %v1918_v40 }
  0x5a   :  { %1773 = vmatprep.subr.bf16.mxu1 %v1919_v41 }
  0x5c   :  { %1752 = vmatpush3.bf16.msra.mxu0 %v1920_v42 }
  0x5d   :  { %1774 = vmatpush3.bf16.msra.mxu1 %v1921_v43  ;;  %1753 = vmatprep.subr.bf16.mxu0 %v1922_v44 }
  0x5e   :  { %1775 = vmatprep.subr.bf16.mxu1 %v1923_v45 }
  0x60   :  { %1754 = vmatpush3.bf16.msra.mxu0 %v1924_v46 }
  0x61   :  { %1776 = vmatpush3.bf16.msra.mxu1 %v1925_v47  ;;  %1783 = vmatprep.subr.bf16.mxu0 %v1926_v56 }
  0x62   :  { %1805 = vmatprep.subr.bf16.mxu1 %v1927_v57 }
  0x63   :  { %1340 = vmatmul.mubr.bf16.vlgmr.msra.gmra.mxu0 %v1506_v52 }
  0x64   :  { %1381 = vmatmul.mubr.bf16.vlgmr.msra.gmra.mxu1 %v1508_v54  ;;  %1784 = vmatpush3.bf16.msra.mxu0 %v1928_v58 }
  0x65   :  { %1806 = vmatpush3.bf16.msra.mxu1 %v1929_v59  ;;  %1785 = vmatprep.subr.bf16.mxu0 %v1930_v60 }
  0x66   :  { %1807 = vmatprep.subr.bf16.mxu1 %v1931_v61 }
  0x68   :  { %1786 = vmatpush3.bf16.msra.mxu0 %v1932_v62 }
  0x69   :  { %1808 = vmatpush3.bf16.msra.mxu1 %v1933_v63  ;;  %1787 = vmatprep.subr.bf16.mxu0 %v1934_v0 }
  0x6a   :  { %1809 = vmatprep.subr.bf16.mxu1 %v1935_v1 }
  0x6c   :  { %1788 = vmatpush3.bf16.msra.mxu0 %v1936_v2 }
  0x6d   :  { %1810 = vmatpush3.bf16.msra.mxu1 %v1937_v3  ;;  %1789 = vmatprep.subr.bf16.mxu0 %v1938_v4 }
  0x6e   :  { %1811 = vmatprep.subr.bf16.mxu1 %v1939_v5 }
  0x70   :  { %1790 = vmatpush3.bf16.msra.mxu0 %v1940_v6 }
  0x71   :  { %1812 = vmatpush3.bf16.msra.mxu1 %v1941_v7  ;;  %1791 = vmatprep.subr.bf16.mxu0 %v1942_v8 }
  0x72   :  { %1813 = vmatprep.subr.bf16.mxu1 %v1943_v9 }
  0x74   :  { %1792 = vmatpush3.bf16.msra.mxu0 %v1944_v10 }
  0x75   :  { %1814 = vmatpush3.bf16.msra.mxu1 %v1945_v11  ;;  %1793 = vmatprep.subr.bf16.mxu0 %v1946_v12 }
  0x76   :  { %1815 = vmatprep.subr.bf16.mxu1 %v1947_v13 }
  0x78   :  { %1794 = vmatpush3.bf16.msra.mxu0 %v1948_v14 }
  0x79   :  { %1816 = vmatpush3.bf16.msra.mxu1 %v1949_v15  ;;  %1795 = vmatprep.subr.bf16.mxu0 %v1950_v16 }
  0x7a   :  { %1817 = vmatprep.subr.bf16.mxu1 %v1951_v17 }
  0x7c   :  { %1796 = vmatpush3.bf16.msra.mxu0 %v1952_v18 }
  0x7d   :  { %1818 = vmatpush3.bf16.msra.mxu1 %v1953_v19  ;;  %1797 = vmatprep.subr.bf16.mxu0 %v1954_v20 }
  0x7e   :  { %1819 = vmatprep.subr.bf16.mxu1 %v1955_v21 }
  0x80   :  { %1798 = vmatpush3.bf16.msra.mxu0 %v1956_v22 }
  0x81   :  { %1820 = vmatpush3.bf16.msra.mxu1 %v1957_v23 }
  0x82   :  { %8 = vsyncpa [#allocation3], 0  ;;  %v1512_v30 = vcombine.low %v23_v26, %v31_v29  ;;  %v1513_v31 = vcombine.high %v23_v26, %v31_v29  ;;  %1421 = vmatprep.mubr.bf16.mxu0 %v1511_v28  ;;  %v1497_v50 = vld [vmem:[%s2443_s2] ss:$0 sm:$0xff]  ;;  %s1980_s2 = smov [#allocation2]  }
  0x83   :  { %1422 = vmatmul.mubr.bf16.vlgmr.msra.gmra.mxu0 %v1510_v27  ;;  %s1486_s30 = sshll.u32 %s1980_s2, 4  ;;  %s1487_s30 = int_to_ptr.vmem [resolvable:$true] %s1486_s30 }
  0x84   :  { %1462 = vmatprep.mubr.bf16.mxu1 %v1513_v31  ;;  %s1958_s4 = scalar_lea.vmem %s1487_s30, 128  ;;  %p1963_p1 = scmp.lt.s32.totalorder %s1487_s30, %s1487_s30 }
  0x85   :  { %1463 = vmatmul.mubr.bf16.vlgmr.msra.gmra.mxu1 %v1512_v30  ;;  %p1959_p0 = scmp.ne.s32.totalorder %s1487_s30, %s1958_s4  ;;  %p1964_p2 = scmp.lt.s32.totalorder %s1958_s4, %s1958_s4 }
  0x87   :  { %p1965_p3 = por %p1964_p2, %p1963_p1 }
  0x89   :  { %p1966_p4 = pnand %p1965_p3, %p1959_p0 }
  0xe3   :  { %v1667_v32 = vpop.f32.mrf.mxu0 }
  0xe4   :  { %v1689_v33 = vpop.f32.mrf.mxu1 }
  0xe5   :  { %v1668_v34 = vpop.f32.mrf.mxu0 }
  0xe6   :  { %v1690_v35 = vpop.f32.mrf.mxu1  ;;  %v1669_v48 = vadd.f32 %v1668_v34, %v1667_v32 }
  0xe7   :  { %v1670_v36 = vpop.f32.mrf.mxu0  ;;  %v1691_v55 = vadd.f32 %v1690_v35, %v1689_v33 }
  0xe8   :  { %v1692_v37 = vpop.f32.mrf.mxu1  ;;  %v1178_v54 = vadd.f32 %v1669_v48, %v1497_v50 }
  0xe9   :  { %v1671_v38 = vpop.f32.mrf.mxu0 }
  0xea   :  { %v1693_v40 = vpop.f32.mrf.mxu1  ;;  %v1672_v51 = vadd.f32 %v1671_v38, %v1670_v36  ;;  %v1219_v60 = vadd.f32 %v1691_v55, %v1178_v54 }
  0xeb   :  { %v1694_v61 = vadd.f32 %v1693_v40, %v1692_v37 }
  0xec   :  { %v1181_v56 = vadd.f32 %v1672_v51, %v1497_v50 }
  0xee   :  { %v1222_v63 = vadd.f32 %v1694_v61, %v1181_v56 }
 0x103   :  { %v1711_v39 = vpop.f32.mrf.mxu0 }
 0x104   :  { %v1733_v41 = vpop.f32.mrf.mxu1 }
 0x105   :  { %v1712_v42 = vpop.f32.mrf.mxu0 }
 0x106   :  { %v1734_v43 = vpop.f32.mrf.mxu1  ;;  %v1713_v57 = vadd.f32 %v1712_v42, %v1711_v39 }
 0x107   :  { %v1714_v44 = vpop.f32.mrf.mxu0  ;;  %v1735_v1 = vadd.f32 %v1734_v43, %v1733_v41 }
 0x108   :  { %v1736_v45 = vpop.f32.mrf.mxu1  ;;  %v1260_v0 = vadd.f32 %v1713_v57, %v1219_v60 }
 0x109   :  { %v1715_v46 = vpop.f32.mrf.mxu0 }
 0x10a   :  { %v1737_v49 = vpop.f32.mrf.mxu1  ;;  %v1716_v62 = vadd.f32 %v1715_v46, %v1714_v44  ;;  %v1301_v6 = vadd.f32 %v1735_v1, %v1260_v0 }
 0x10b   :  { %v1738_v7 = vadd.f32 %v1737_v49, %v1736_v45 }
 0x10c   :  { %v1263_v4 = vadd.f32 %v1716_v62, %v1222_v63 }
 0x10e   :  { %v1304_v11 = vadd.f32 %v1738_v7, %v1263_v4 }
 0x123   :  { %v1755_v47 = vpop.f32.mrf.mxu0 }
 0x124   :  { %v1777_v52 = vpop.f32.mrf.mxu1 }
 0x125   :  { %v1756_v53 = vpop.f32.mrf.mxu0 }
 0x126   :  { %v1778_v58 = vpop.f32.mrf.mxu1  ;;  %v1757_v5 = vadd.f32 %v1756_v53, %v1755_v47 }
 0x127   :  { %v1758_v59 = vpop.f32.mrf.mxu0  ;;  %v1779_v13 = vadd.f32 %v1778_v58, %v1777_v52 }
 0x128   :  { %v1780_v2 = vpop.f32.mrf.mxu1  ;;  %v1342_v12 = vadd.f32 %v1757_v5, %v1301_v6 }
 0x129   :  { %v1759_v3 = vpop.f32.mrf.mxu0 }
 0x12a   :  { %v1760_v8 = vadd.f32 %v1759_v3, %v1758_v59  ;;  %v1781_v9 = vpop.f32.mrf.mxu1  ;;  %v1383_v20 = vadd.f32 %v1779_v13, %v1342_v12 }
 0x12b   :  { %v1782_v21 = vadd.f32 %v1781_v9, %v1780_v2 }
 0x12c   :  { %v1345_v16 = vadd.f32 %v1760_v8, %v1304_v11 }
 0x12e   :  { %v1386_v24 = vadd.f32 %v1782_v21, %v1345_v16 }
 0x143   :  { %v1799_v10 = vpop.f32.mrf.mxu0 }
 0x145   :  { %v1821_v14 = vpop.f32.mrf.mxu1  ;;  %v1800_v15 = vpop.f32.mrf.mxu0 }
 0x146   :  { %v1801_v17 = vadd.f32 %v1800_v15, %v1799_v10 }
 0x147   :  { %v1822_v18 = vpop.f32.mrf.mxu1  ;;  %v1802_v19 = vpop.f32.mrf.mxu0 }
 0x148   :  { %v1424_v25 = vadd.f32 %v1801_v17, %v1383_v20  ;;  %v1823_v28 = vadd.f32 %v1822_v18, %v1821_v14 }
 0x149   :  { %v1824_v22 = vpop.f32.mrf.mxu1  ;;  %v1803_v23 = vpop.f32.mrf.mxu0 }
 0x14a   :  { %v1804_v26 = vadd.f32 %v1803_v23, %v1802_v19  ;;  %v1465_v31 = vadd.f32 %v1823_v28, %v1424_v25 }
 0x14b   :  { %v1825_v27 = vpop.f32.mrf.mxu1 }
 0x14c   :  { %v1427_v29 = vadd.f32 %v1804_v26, %v1386_v24  ;;  %v1826_v30 = vadd.f32 %v1825_v27, %v1824_v22 }
 0x14e   :  { %v1468_v32 = vadd.f32 %v1826_v30, %v1427_v29 }
 0x150   :  { %v1649_v33 = vpack.c.bf16 %v1468_v32, %v1465_v31 }
 0x152   :  { %1650 = vst [vmem:[#allocation2] sm:$0xff] %v1649_v33  }
 0x153   :  { %1969 = shalt.err (!%p1966_p4)
}
 0x154   :  { %s1981_s5 = smov 64   ;;  %s1982_s6 = smov 4  }
 0x155   :  { %1492 = dma.vmem_to_hbm [thread:$0]  %s1487_s30, 128, %s2444_s3, [#allocation3], %s1981_s5, %s1981_s5, %s1982_s6  }
 0x156   :  { %1978 = dma.done.wait [#allocation3], 128  }
 0x157   :  { %1979 = vsyncadd [#allocation3], 4294967168 }
 0x158   :  { %1496 = vsyncpa [#allocation3], 1 }

</bundles_post_ra>
